<compile_context>
chip_gen: v7x
topology: tpu7x:2x2x1
jax: 0.10.0
libtpu: 0.0.40
codegen_flags: <defaults>
</compile_context>

<pallas_src>
import functools

import jax
import jax.numpy as jnp
from jax import lax
from jax.experimental import pallas as pl
from jax.experimental.pallas import tpu as pltpu

_CS = 8              # rows (of 128 lanes) per in-register chunk == sublanes per f32 vreg
_MAX_ROWS = 1024     # rows per grid step cap (128K lanes)


def _vmem_limit_bytes():
    """Scoped VMEM limit: ~3/4 of physical, capped (96 MiB v5e/v6e, 48 MiB v7x)."""
    try:
        cap = int(getattr(pltpu.get_tpu_info(), "vmem_capacity_bytes", 64 << 20))
    except Exception:
        cap = 64 << 20                      # v7x lower bound; safe everywhere
    return int(min(cap * 3 // 4, 100 << 20))


def _pick_rows(c, rows, itemsize_x, itemsize_t, vmem_limit):
    """Rows per block: biggest multiple of 8 whose double-buffered input blocks fit
    in half the scoped VMEM limit (the other half covers the resident accumulator
    block, Mosaic internal scratch and any temporaries)."""
    budget = vmem_limit // 2
    per_row = c * 128 * (itemsize_x + itemsize_t) * 2   # x2 = double buffering
    ts = budget // per_row
    ts = min(ts, _MAX_ROWS, pl.cdiv(rows, _CS) * _CS)
    ts = max(ts, _CS)
    return int((ts // _CS) * _CS)


def _stats_kernel(x_ref, t_ref, o_ref, *, hw, ts, cs, tps, split):
    """x_ref, t_ref: (C, TS, 128) logits / targets for one (batch, split, tile).
    o_ref: (3, C, 8, 128) VMEM-resident accumulator [intersection, pred-sum, true-sum]."""
    i = pl.program_id(2)

    @pl.when(i == 0)
    def _init():
        o_ref[...] = jnp.zeros_like(o_ref)

    c = x_ref.shape[0]
    n_chunks = ts // cs
    g = pl.program_id(1) * tps + i           # global spatial tile index
    base_row = g * ts                        # first 128-lane row of this tile

    def softmax_probs(x):
        # Channel axis is the leading (non-layout) dim: max/sum over C lower to
        # elementwise VALU ops on full vregs; exp + divide go to the EUP.
        m = jnp.max(x, axis=0, keepdims=True)
        e = jnp.exp(x - m)
        denom = jnp.sum(e, axis=0, keepdims=True)
        return e * (1.0 / denom)             # exact division (matches torch.softmax)

    def make_body(masked):
        def body(k, carry):
            acc_i, acc_p, acc_t = carry
            off = pl.multiple_of(k * cs, cs)
            x = x_ref[:, pl.ds(off, cs), :].astype(jnp.float32)   # (C, cs, 128)
            t = t_ref[:, pl.ds(off, cs), :].astype(jnp.float32)
            if masked:
                row = lax.broadcasted_iota(jnp.int32, (1, cs, 128), 1)
                lane = lax.broadcasted_iota(jnp.int32, (1, cs, 128), 2)
                pos = (base_row + off + row) * 128 + lane          # (1, cs, 128)
                valid = pos < hw
                x = jnp.where(valid, x, 0.0)
                t = jnp.where(valid, t, 0.0)
            p = softmax_probs(x)
            if masked:
                p = jnp.where(valid, p, 0.0)
            return (acc_i + p * t, acc_p + p, acc_t + t)
        return body

    def accumulate(masked):
        zero = jnp.zeros((c, cs, 128), jnp.float32)
        init = (zero, zero, zero)
        if n_chunks == 1:
            acc_i, acc_p, acc_t = make_body(masked)(0, init)
        else:
            unroll = 4 if n_chunks % 4 == 0 else (2 if n_chunks % 2 == 0 else 1)
            acc_i, acc_p, acc_t = lax.fori_loop(
                0, n_chunks, make_body(masked), init, unroll=unroll)
        # one small VMEM RMW per grid step (not per chunk)
        o_ref[0, ...] = o_ref[0, ...] + acc_i
        o_ref[1, ...] = o_ref[1, ...] + acc_p
        o_ref[2, ...] = o_ref[2, ...] + acc_t

    covered = split * tps * ts * 128          # lanes addressed by the whole grid (static)
    if covered == hw:                         # every tile fully valid: no mask path emitted
        accumulate(False)
    else:
        full_tiles = hw // (ts * 128)         # tiles [0, full_tiles) need no masking
        if full_tiles == 0:
            accumulate(True)
        else:
            @pl.when(g < full_tiles)
            def _full():
                accumulate(False)

            @pl.when(g >= full_tiles)
            def _edge():
                accumulate(True)


def _soft_stats(x4, t4, hw):
    """x4, t4: (N, C, R, 128) with R % 8 == 0; hw = number of valid spatial positions.
    Returns (3, C) float32: per-class [intersection, pred_sum, true_sum]."""
    n, c, r, _ = x4.shape
    vmem_limit = _vmem_limit_bytes()

    # Odd batch (e.g. N == 1): split the spatial tiles into 2 parallel halves so
    # both v7x TensorCores get work.  Harmless on single-TC v5e/v6e.
    split = 2 if (n % 2 == 1 and r >= 2 * _CS) else 1
    ts = _pick_rows(c, pl.cdiv(r, split), x4.dtype.itemsize, t4.dtype.itemsize, vmem_limit)
    n_tiles = pl.cdiv(r, ts)
    tps = pl.cdiv(n_tiles, split)            # tiles per split

    if split * tps == n_tiles:
        in_map = lambda b, s, i: (b, 0, s * tps + i, 0)
    else:
        last = n_tiles - 1                   # clamp fully-OOB tiles (kernel masks them out)
        in_map = lambda b, s, i: (b, 0, jnp.minimum(s * tps + i, last), 0)
    out_map = lambda b, s, i: (b, s, 0, 0, 0, 0)

    kernel = functools.partial(_stats_kernel, hw=hw, ts=ts, cs=_CS, tps=tps, split=split)

    partials = pl.pallas_call(
        kernel,
        out_shape=jax.ShapeDtypeStruct((n, split, 3, c, _CS, 128), jnp.float32),
        grid_spec=pltpu.PrefetchScalarGridSpec(
            num_scalar_prefetch=0,
            grid=(n, split, tps),
            in_specs=[
                pl.BlockSpec((None, c, ts, 128), in_map),
                pl.BlockSpec((None, c, ts, 128), in_map),
            ],
            out_specs=pl.BlockSpec((None, None, 3, c, _CS, 128), out_map),
        ),
        compiler_params=pltpu.CompilerParams(
            dimension_semantics=("parallel", "parallel", "arbitrary"),
            vmem_limit_bytes=vmem_limit,
        ),
    )(x4, t4)
    return jnp.sum(partials, axis=(0, 1, 4, 5))   # (3, C)


@functools.partial(jax.jit, static_argnames=("alpha", "tv_alpha", "tv_beta"))
def combined_loss(y_pred, y_true, alpha=0.5, tv_alpha=0.7, tv_beta=0.3):
    """y_pred: (N, C, H, W) logits; y_true: (N, C, H, W) one-hot / probability target."""
    # TODO(synk): pallas_call has no automatic VJP; wrap in jax.custom_vjp before jax.grad.
    smooth = 0.0
    eps = 1e-7

    n, c, h, w = y_pred.shape
    hw = h * w
    r = pl.cdiv(hw, _CS * 128) * _CS         # 128-lane rows, rounded up to a sublane multiple
    hw_pad = r * 128

    logits = y_pred.reshape(n, c, hw)        # contiguous reshape, no HBM copy
    target = y_true.reshape(n, c, hw)        # native dtype; upcast on load in-kernel
    if hw_pad != hw:                         # rare fallback: one pad copy, kernel masks the tail
        pad = ((0, 0), (0, 0), (0, hw_pad - hw))
        logits = jnp.pad(logits, pad)
        target = jnp.pad(target, pad)
    x4 = logits.reshape(n, c, r, 128)
    t4 = target.reshape(n, c, r, 128)

    stats = _soft_stats(x4, t4, hw)          # (3, C)
    inter, psum, tsum = stats[0], stats[1], stats[2]

    # smp convention: classes absent from y_true contribute 0 to the mean
    present = (tsum > 0).astype(jnp.float32)

    # Dice: (2I + s) / clamp(P + T + s, eps)
    dice_score = (2.0 * inter + smooth) / jnp.maximum(psum + tsum + smooth, eps)
    dice_loss = jnp.mean((1.0 - dice_score) * present)

    # Tversky: (I + s) / clamp(I + a*FP + b*FN + s, eps), FP = P - I, FN = T - I
    fp = psum - inter
    fn = tsum - inter
    tv_score = (inter + smooth) / jnp.maximum(
        inter + tv_alpha * fp + tv_beta * fn + smooth, eps)
    tversky_loss = jnp.mean((1.0 - tv_score) * present)

    return alpha * dice_loss + (1.0 - alpha) * tversky_loss


def _reference_loss(y_pred, y_true, alpha=0.5, tv_alpha=0.7, tv_beta=0.3):
    """Pure-JAX reference with identical semantics (for validation)."""
    smooth, eps = 0.0, 1e-7
    p = jax.nn.softmax(y_pred.astype(jnp.float32), axis=1)
    t = y_true.astype(jnp.float32)
    dims = (0, 2, 3)
    inter = jnp.sum(p * t, axis=dims)
    psum = jnp.sum(p, axis=dims)
    tsum = jnp.sum(t, axis=dims)
    present = (tsum > 0).astype(jnp.float32)
    dice = (2.0 * inter + smooth) / jnp.maximum(psum + tsum + smooth, eps)
    dice_loss = jnp.mean((1.0 - dice) * present)
    fp, fn = psum - inter, tsum - inter
    tv = (inter + smooth) / jnp.maximum(inter + tv_alpha * fp + tv_beta * fn + smooth, eps)
    tv_loss = jnp.mean((1.0 - tv) * present)
    return alpha * dice_loss + (1.0 - alpha) * tv_loss


if __name__ == "__main__":
    key = jax.random.PRNGKey(0)
    k1, k2 = jax.random.split(key)

    N, C, H, W = 2, 4, 16, 16
    y_pred = jax.random.normal(k1, (N, C, H, W), dtype=jnp.float32)       # logits
    labels = jax.random.randint(k2, (N, H, W), 0, C)                      # class ids
    y_true = jax.nn.one_hot(labels, C, axis=1, dtype=jnp.float32)         # (N, C, H, W)

    loss = combined_loss(y_pred, y_true, alpha=0.5)
    jax.block_until_ready(loss)

    ref = _reference_loss(y_pred, y_true, alpha=0.5)
    assert loss.shape == ()
    assert bool(jnp.isfinite(loss))
    assert abs(float(loss) - float(ref)) <= 1e-4 * max(1.0, abs(float(ref))), (
        float(loss), float(ref))
    print("KERNEL_OK")
</pallas_src>

<mosaic_0001>
module attributes {stable_mosaic.version = 11 : i64} {
  func.func @_stats_kernel(%arg0: i32, %arg1: i32, %arg2: i32, %arg3: memref<1x4x8x128xf32, #tpu.memory_space<vmem>>, %arg4: memref<1x4x8x128xf32, #tpu.memory_space<vmem>>, %arg5: memref<1x1x3x4x8x128xf32, #tpu.memory_space<vmem>>) attributes {dimension_semantics = [#tpu.dimension_semantics<parallel>, #tpu.dimension_semantics<parallel>, #tpu.dimension_semantics<arbitrary>], iteration_bounds = array<i64: 2, 1, 1>, scalar_prefetch = 0 : i64, scratch_operands = 0 : i64, tpu.core_type = #tpu.core_type<tc>, window_params = [{transform_indices = @transform_0, window_bounds = array<i64: 1, 4, 8, 128>}, {transform_indices = @transform_1, window_bounds = array<i64: 1, 4, 8, 128>}, {transform_indices = @transform_2, window_bounds = array<i64: 1, 1, 3, 4, 8, 128>}]} {
    %c0_i32 = arith.constant 0 : i32
    %0 = arith.cmpi eq, %arg2, %c0_i32 : i32
    %1 = arith.extui %0 : i1 to i32
    %c0_i32_0 = arith.constant 0 : i32
    %2 = arith.cmpi ne, %1, %c0_i32_0 : i32
    scf.if %2 {
      %cst_47 = arith.constant 0.000000e+00 : f32
      %69 = vector.broadcast %cst_47 : f32 to vector<3x4x8x128xf32>
      %c0_48 = arith.constant 0 : index
      %c0_49 = arith.constant 0 : index
      %c0_50 = arith.constant 0 : index
      %c0_51 = arith.constant 0 : index
      %c0_52 = arith.constant 0 : index
      %c0_53 = arith.constant 0 : index
      %70 = vector.load %arg5[%c0_48, %c0_49, %c0_50, %c0_51, %c0_52, %c0_53] : memref<1x1x3x4x8x128xf32, #tpu.memory_space<vmem>>, vector<1x1x3x4x8x128xf32>
      %71 = vector.shape_cast %70 : vector<1x1x3x4x8x128xf32> to vector<3x4x8x128xf32>
      %72 = vector.shape_cast %69 : vector<3x4x8x128xf32> to vector<1x1x3x4x8x128xf32>
      tpu.vector_store %arg5[%c0_48, %c0_49, %c0_50, %c0_51, %c0_52, %c0_53], %72 {strides = array<i32>} : memref<1x1x3x4x8x128xf32, #tpu.memory_space<vmem>>, vector<1x1x3x4x8x128xf32>,
    } else {
    }
    %c1_i32 = arith.constant 1 : i32
    %3 = arith.muli %arg1, %c1_i32 : i32
    %4 = arith.addi %3, %arg2 : i32
    %c8_i32 = arith.constant 8 : i32
    %5 = arith.muli %4, %c8_i32 : i32
    %cst = arith.constant 0.000000e+00 : f32
    %6 = vector.broadcast %cst : f32 to vector<4x8x128xf32>
    %c0_i32_1 = arith.constant 0 : i32
    %7 = tpu.assume_multiple %c0_i32_1, 8 : i32
    %c0 = arith.constant 0 : index
    %c0_2 = arith.constant 0 : index
    %8 = arith.index_cast %7 : i32 to index
    %c0_3 = arith.constant 0 : index
    %9 = vector.load %arg3[%c0, %c0_2, %8, %c0_3] : memref<1x4x8x128xf32, #tpu.memory_space<vmem>>, vector<1x4x8x128xf32>
    %10 = vector.shape_cast %9 : vector<1x4x8x128xf32> to vector<4x8x128xf32>
    %c0_4 = arith.constant 0 : index
    %c0_5 = arith.constant 0 : index
    %11 = arith.index_cast %7 : i32 to index
    %c0_6 = arith.constant 0 : index
    %12 = vector.load %arg4[%c0_4, %c0_5, %11, %c0_6] : memref<1x4x8x128xf32, #tpu.memory_space<vmem>>, vector<1x4x8x128xf32>
    %13 = vector.shape_cast %12 : vector<1x4x8x128xf32> to vector<4x8x128xf32>
    %14 = tpu.iota {dimensions = array<i32: 1>} : vector<1x8x128xi32>
    %15 = tpu.iota {dimensions = array<i32: 2>} : vector<1x8x128xi32>
    %16 = arith.addi %5, %7 : i32
    %17 = vector.broadcast %16 : i32 to vector<1x8x128xi32>
    %18 = arith.addi %17, %14 : vector<1x8x128xi32>
    %c128_i32 = arith.constant 128 : i32
    %19 = vector.broadcast %c128_i32 : i32 to vector<1x8x128xi32>
    %20 = arith.muli %18, %19 : vector<1x8x128xi32>
    %21 = arith.addi %20, %15 : vector<1x8x128xi32>
    %c256_i32 = arith.constant 256 : i32
    %22 = vector.broadcast %c256_i32 : i32 to vector<1x8x128xi32>
    %23 = arith.cmpi slt, %21, %22 : vector<1x8x128xi32>
    %cst_7 = arith.constant 0.000000e+00 : f32
    %24 = vector.shape_cast %23 : vector<1x8x128xi1> to vector<1x8x128xi1>
    %25 = vector.broadcast %24 : vector<1x8x128xi1> to vector<4x8x128xi1>
    %26 = vector.broadcast %cst_7 : f32 to vector<4x8x128xf32>
    %27 = arith.select %25, %10, %26 : vector<4x8x128xi1>, vector<4x8x128xf32>
    %cst_8 = arith.constant 0.000000e+00 : f32
    %28 = vector.shape_cast %23 : vector<1x8x128xi1> to vector<1x8x128xi1>
    %29 = vector.broadcast %28 : vector<1x8x128xi1> to vector<4x8x128xi1>
    %30 = vector.broadcast %cst_8 : f32 to vector<4x8x128xf32>
    %31 = arith.select %29, %13, %30 : vector<4x8x128xi1>, vector<4x8x128xf32>
    %cst_9 = arith.constant dense<0xFF800000> : vector<8x128xf32>
    %32 = vector.multi_reduction <maximumf>, %27, %cst_9 [0] : vector<4x8x128xf32> to vector<8x128xf32>
    %33 = vector.shape_cast %32 : vector<8x128xf32> to vector<1x8x128xf32>
    %34 = vector.broadcast %33 : vector<1x8x128xf32> to vector<4x8x128xf32>
    %35 = arith.subf %27, %34 : vector<4x8x128xf32>
    %36 = math.exp %35 : vector<4x8x128xf32>
    %cst_10 = arith.constant dense<0.000000e+00> : vector<8x128xf32>
    %37 = vector.multi_reduction <add>, %36, %cst_10 [0] : vector<4x8x128xf32> to vector<8x128xf32>
    %38 = vector.shape_cast %37 : vector<8x128xf32> to vector<1x8x128xf32>
    %cst_11 = arith.constant 1.000000e+00 : f32
    %39 = vector.broadcast %cst_11 : f32 to vector<1x8x128xf32>
    %40 = arith.divf %39, %38 : vector<1x8x128xf32>
    %41 = vector.broadcast %40 : vector<1x8x128xf32> to vector<4x8x128xf32>
    %42 = arith.mulf %36, %41 : vector<4x8x128xf32>
    %cst_12 = arith.constant 0.000000e+00 : f32
    %43 = vector.shape_cast %23 : vector<1x8x128xi1> to vector<1x8x128xi1>
    %44 = vector.broadcast %43 : vector<1x8x128xi1> to vector<4x8x128xi1>
    %45 = vector.broadcast %cst_12 : f32 to vector<4x8x128xf32>
    %46 = arith.select %44, %42, %45 : vector<4x8x128xi1>, vector<4x8x128xf32>
    %47 = arith.mulf %46, %31 : vector<4x8x128xf32>
    %48 = arith.addf %6, %47 : vector<4x8x128xf32>
    %49 = arith.addf %6, %46 : vector<4x8x128xf32>
    %50 = arith.addf %6, %31 : vector<4x8x128xf32>
    %c0_13 = arith.constant 0 : index
    %c0_14 = arith.constant 0 : index
    %c0_15 = arith.constant 0 : index
    %c0_16 = arith.constant 0 : index
    %c0_17 = arith.constant 0 : index
    %c0_18 = arith.constant 0 : index
    %51 = vector.load %arg5[%c0_13, %c0_14, %c0_15, %c0_16, %c0_17, %c0_18] : memref<1x1x3x4x8x128xf32, #tpu.memory_space<vmem>>, vector<1x1x1x4x8x128xf32>
    %52 = vector.shape_cast %51 : vector<1x1x1x4x8x128xf32> to vector<4x8x128xf32>
    %53 = arith.addf %52, %48 : vector<4x8x128xf32>
    %c0_19 = arith.constant 0 : index
    %c0_20 = arith.constant 0 : index
    %c0_21 = arith.constant 0 : index
    %c0_22 = arith.constant 0 : index
    %c0_23 = arith.constant 0 : index
    %c0_24 = arith.constant 0 : index
    %54 = vector.load %arg5[%c0_19, %c0_20, %c0_21, %c0_22, %c0_23, %c0_24] : memref<1x1x3x4x8x128xf32, #tpu.memory_space<vmem>>, vector<1x1x1x4x8x128xf32>
    %55 = vector.shape_cast %54 : vector<1x1x1x4x8x128xf32> to vector<4x8x128xf32>
    %56 = vector.shape_cast %53 : vector<4x8x128xf32> to vector<1x1x1x4x8x128xf32>
    tpu.vector_store %arg5[%c0_19, %c0_20, %c0_21, %c0_22, %c0_23, %c0_24], %56 {strides = array<i32>} : memref<1x1x3x4x8x128xf32, #tpu.memory_space<vmem>>, vector<1x1x1x4x8x128xf32>,
    %c0_25 = arith.constant 0 : index
    %c0_26 = arith.constant 0 : index
    %c1 = arith.constant 1 : index
    %c0_27 = arith.constant 0 : index
    %c0_28 = arith.constant 0 : index
    %c0_29 = arith.constant 0 : index
    %57 = vector.load %arg5[%c0_25, %c0_26, %c1, %c0_27, %c0_28, %c0_29] : memref<1x1x3x4x8x128xf32, #tpu.memory_space<vmem>>, vector<1x1x1x4x8x128xf32>
    %58 = vector.shape_cast %57 : vector<1x1x1x4x8x128xf32> to vector<4x8x128xf32>
    %59 = arith.addf %58, %49 : vector<4x8x128xf32>
    %c0_30 = arith.constant 0 : index
    %c0_31 = arith.constant 0 : index
    %c1_32 = arith.constant 1 : index
    %c0_33 = arith.constant 0 : index
    %c0_34 = arith.constant 0 : index
    %c0_35 = arith.constant 0 : index
    %60 = vector.load %arg5[%c0_30, %c0_31, %c1_32, %c0_33, %c0_34, %c0_35] : memref<1x1x3x4x8x128xf32, #tpu.memory_space<vmem>>, vector<1x1x1x4x8x128xf32>
    %61 = vector.shape_cast %60 : vector<1x1x1x4x8x128xf32> to vector<4x8x128xf32>
    %62 = vector.shape_cast %59 : vector<4x8x128xf32> to vector<1x1x1x4x8x128xf32>
    tpu.vector_store %arg5[%c0_30, %c0_31, %c1_32, %c0_33, %c0_34, %c0_35], %62 {strides = array<i32>} : memref<1x1x3x4x8x128xf32, #tpu.memory_space<vmem>>, vector<1x1x1x4x8x128xf32>,
    %c0_36 = arith.constant 0 : index
    %c0_37 = arith.constant 0 : index
    %c2 = arith.constant 2 : index
    %c0_38 = arith.constant 0 : index
    %c0_39 = arith.constant 0 : index
    %c0_40 = arith.constant 0 : index
    %63 = vector.load %arg5[%c0_36, %c0_37, %c2, %c0_38, %c0_39, %c0_40] : memref<1x1x3x4x8x128xf32, #tpu.memory_space<vmem>>, vector<1x1x1x4x8x128xf32>
    %64 = vector.shape_cast %63 : vector<1x1x1x4x8x128xf32> to vector<4x8x128xf32>
    %65 = arith.addf %64, %50 : vector<4x8x128xf32>
    %c0_41 = arith.constant 0 : index
    %c0_42 = arith.constant 0 : index
    %c2_43 = arith.constant 2 : index
    %c0_44 = arith.constant 0 : index
    %c0_45 = arith.constant 0 : index
    %c0_46 = arith.constant 0 : index
    %66 = vector.load %arg5[%c0_41, %c0_42, %c2_43, %c0_44, %c0_45, %c0_46] : memref<1x1x3x4x8x128xf32, #tpu.memory_space<vmem>>, vector<1x1x1x4x8x128xf32>
    %67 = vector.shape_cast %66 : vector<1x1x1x4x8x128xf32> to vector<4x8x128xf32>
    %68 = vector.shape_cast %65 : vector<4x8x128xf32> to vector<1x1x1x4x8x128xf32>
    tpu.vector_store %arg5[%c0_41, %c0_42, %c2_43, %c0_44, %c0_45, %c0_46], %68 {strides = array<i32>} : memref<1x1x3x4x8x128xf32, #tpu.memory_space<vmem>>, vector<1x1x1x4x8x128xf32>,
    return
  }
  func.func @transform_0(%arg0: i32, %arg1: i32, %arg2: i32) -> (i32, i32, i32, i32) {
    %c1_i32 = arith.constant 1 : i32
    %0 = arith.muli %arg1, %c1_i32 : i32
    %1 = arith.addi %0, %arg2 : i32
    %c0_i32 = arith.constant 0 : i32
    %c0_i32_0 = arith.constant 0 : i32
    %c0_i32_1 = arith.constant 0 : i32
    return %arg0, %c0_i32, %1, %c0_i32_0 : i32, i32, i32, i32
  }
  func.func @transform_1(%arg0: i32, %arg1: i32, %arg2: i32) -> (i32, i32, i32, i32) {
    %c1_i32 = arith.constant 1 : i32
    %0 = arith.muli %arg1, %c1_i32 : i32
    %1 = arith.addi %0, %arg2 : i32
    %c0_i32 = arith.constant 0 : i32
    %c0_i32_0 = arith.constant 0 : i32
    %c0_i32_1 = arith.constant 0 : i32
    return %arg0, %c0_i32, %1, %c0_i32_0 : i32, i32, i32, i32
  }
  func.func @transform_2(%arg0: i32, %arg1: i32, %arg2: i32) -> (i32, i32, i32, i32, i32, i32) {
    %c0_i32 = arith.constant 0 : i32
    %c0_i32_0 = arith.constant 0 : i32
    %c0_i32_1 = arith.constant 0 : i32
    %c0_i32_2 = arith.constant 0 : i32
    %c0_i32_3 = arith.constant 0 : i32
    return %arg0, %arg1, %c0_i32, %c0_i32_0, %c0_i32_1, %c0_i32_2 : i32, i32, i32, i32, i32, i32
  }
}

</mosaic_0001>

<bundles_post_ra>
// kernel: combined_loss.1
= control target key start
LH: loop header
LB: loop body
LE: loop exit
PB: predicated region body
PF: predicated region fallthrough
CT: control target
= control target key end

     0   :  { %s572_s9 = smov 0   ;;  %s574_s10 = smov 0   ;;  %s634_s0 = inlined_call_operand.vmem [shape: f32[2,4,8,128], index: 0, kind: input, shape index: {}]   ;;  %s635_s1 = inlined_call_operand.vmem [shape: f32[2,4,8,128], index: 1, kind: input, shape index: {}]   ;;  %s636_s2 = inlined_call_operand.vmem [shape: f32[2,1,3,4,8,128], index: 2, kind: output, shape index: {}]  }
   0x1   :  { %s576_s11 = smov 0  }
   0x2 LB: > { %s31_s12 = sadd.s32 1, %s551_s10  ;;  %p471_p0 = scmp.ge.s32.totalorder %s555_s11, 1  ;;  %s555_s11 = sphi %s576_s11, %s12_s11   ;;  %s551_s10 = sphi %s574_s10, %s638_s10   ;;  %s547_s9 = sphi %s572_s9, %s637_s9  }
   0x3   : > { %p33_p1 = scmp.ge.s32.totalorder %s31_s12, 2  ;;  %p161_p2 = scmp.lt.s32.totalorder %s555_s11, 3 }
   0x5   : > { %s640_s12 = smov (%p33_p1, %s31_s12), 0  ;;  %p162_p3 = pnand %p471_p0, %p161_p2 }
   0x6   : > { %p201_p4 = scmp.lt.s32.totalorder (!%p162_p3), %s547_s9, 1  ;;  %v255_v0 = vlaneseq (!%p162_p3) }
   0x7   : > { %165 = sbr.rel (%p162_p3) target bundleno = 65 (0x41), region = 28 }
   0x8   : > { %v256_v1 = vshrl.u32 (!%p162_p3), %v255_v0, 7  ;;  %v258_v2 = vand.u32 (!%p162_p3), 127, %v255_v0 }
   0xa   : > { %v262_v3 = vmul.u32 (!%p162_p3), 128, %v256_v1 }
   0xc   : > { %v263_v7 = vadd.s32 (!%p162_p3), %v262_v3, %v258_v2 }
   0xe   : > { %s642_s9 = smov (!%p201_p4, %s547_s9), 1  ;;  %vm264_vm0 = vcmp.lt.s32.totalorder %v263_v7, 256 }
   0xf   : > { %s495_s13 = sshll.u32 %s642_s9, 5  ;;  %s497_s20 = smul.u32 96, %s642_s9 }
  0x10   : > { %s208_s16 = scalar_lea.vmem %s634_s0, %s495_s13  ;;  %s218_s19 = scalar_lea.vmem %s635_s1, %s495_s13 }
  0x11   : > { %v247_v4 = vld [vmem:[%s208_s16] sm:$0xff]  ;;  %v248_v5 = vld [vmem:[%s208_s16 + $0x8] sm:$0xff]  ;;  %v249_v6 = vld [vmem:[%s208_s16 + $0x10] sm:$0xff]  ;;  %s603_s23 = scalar_lea.vmem %s636_s2, %s497_s20 }
  0x12   : > { %v250_v8 = vld [vmem:[%s208_s16 + $0x18] sm:$0xff]  ;;  %v251_v9 = vld [vmem:[%s218_s19] sm:$0xff]  ;;  %v252_v10 = vld [vmem:[%s218_s19 + $0x8] sm:$0xff]  ;;  %v267_v13 = vsel %vm264_vm0, %v247_v4, 0.0  ;;  %v268_v14 = vsel %vm264_vm0, %v248_v5, 0.0  ;;  %v269_v15 = vsel %vm264_vm0, %v249_v6, 0.0 }
  0x13   : > { %v253_v11 = vld [vmem:[%s218_s19 + $0x10] sm:$0xff]  ;;  %v254_v12 = vld [vmem:[%s218_s19 + $0x18] sm:$0xff]  ;;  %v270_v16 = vsel %vm264_vm0, %v250_v8, 0.0  ;;  %v271_v17 = vsel %vm264_vm0, %v251_v9, 0.0  ;;  %v275_v18 = vmax.f32 %v267_v13, %v268_v14  ;;  %v272_v20 = vsel %vm264_vm0, %v252_v10, 0.0 }
  0x14   : > { %v276_v19 = vmax.f32 %v269_v15, %v270_v16  ;;  %v273_v21 = vsel %vm264_vm0, %v253_v11, 0.0  ;;  %v274_v22 = vsel %vm264_vm0, %v254_v12, 0.0  ;;  %489 = vst [vmem:[%s603_s23 + $0x40] sm:$0xff] %v271_v17  ;;  %490 = vst [vmem:[%s603_s23 + $0x48] sm:$0xff] %v272_v20 }
  0x15   : > { %491 = vst [vmem:[%s603_s23 + $0x50] sm:$0xff] %v273_v21  ;;  %492 = vst [vmem:[%s603_s23 + $0x58] sm:$0xff] %v274_v22 }
  0x16   : > { %v277_v23 = vmax.f32 %v275_v18, %v276_v19 }
  0x18   : > { %v278_v24 = vsub.f32 %v267_v13, %v277_v23  ;;  %v279_v25 = vsub.f32 %v268_v14, %v277_v23  ;;  %v280_v26 = vsub.f32 %v269_v15, %v277_v23  ;;  %v281_v27 = vsub.f32 %v270_v16, %v277_v23 }
  0x1a   : > { %v282_v28 = vmul.f32 1.442695, %v278_v24  ;;  %v284_v29 = vmul.f32 1.442695, %v279_v25  ;;  %v286_v30 = vmul.f32 1.442695, %v280_v26 }
  0x1b   : > { %v288_v31 = vmul.f32 1.442695, %v281_v27 }
  0x1c   : > { %523 = vpow2.f32 %v282_v28 }
  0x1d   : > { %525 = vpow2.f32 %v284_v29 }
  0x1e   : > { %527 = vpow2.f32 %v286_v30 }
  0x1f   : > { %529 = vpow2.f32 %v288_v31 }
  0x26   : > { %v524_v32 = vpop.eup %523 }
  0x27   : > { %v526_v33 = vpop.eup %525 }
  0x28   : > { %v528_v34 = vpop.eup %527  ;;  %v290_v35 = vadd.f32 %v526_v33, %v524_v32 }
  0x29   : > { %v530_v36 = vpop.eup %529 }
  0x2a   : > { %v291_v37 = vadd.f32 %v528_v34, %v290_v35 }
  0x2c   : > { %v292_v38 = vadd.f32 %v530_v36, %v291_v37 }
  0x2e   : > { %531 = vrcp.f32 %v292_v38 }
  0x38   : > { %v532_v39 = vpop.eup %531 }
  0x39   : > { %v295_v40 = vmul.f32 %v532_v39, %v524_v32  ;;  %v296_v41 = vmul.f32 %v532_v39, %v526_v33  ;;  %v297_v42 = vmul.f32 %v532_v39, %v528_v34  ;;  %v298_v43 = vmul.f32 %v532_v39, %v530_v36 }
  0x3b   : > { %v299_v44 = vsel %vm264_vm0, %v295_v40, 0.0  ;;  %v300_v45 = vsel %vm264_vm0, %v296_v41, 0.0  ;;  %v301_v46 = vsel %vm264_vm0, %v297_v42, 0.0  ;;  %v302_v47 = vsel %vm264_vm0, %v298_v43, 0.0 }
  0x3c   : > { %v303_v48 = vmul.f32 %v299_v44, %v271_v17  ;;  %v304_v49 = vmul.f32 %v300_v45, %v272_v20  ;;  %v305_v50 = vmul.f32 %v301_v46, %v273_v21  ;;  %v306_v51 = vmul.f32 %v302_v47, %v274_v22  ;;  %481 = vst [vmem:[%s603_s23 + $0x20] sm:$0xff] %v299_v44 }
  0x3d   : > { %482 = vst [vmem:[%s603_s23 + $0x28] sm:$0xff] %v300_v45  ;;  %483 = vst [vmem:[%s603_s23 + $0x30] sm:$0xff] %v301_v46 }
  0x3e   : > { %484 = vst [vmem:[%s603_s23 + $0x38] sm:$0xff] %v302_v47  ;;  %327 = vst [vmem:[%s603_s23] sm:$0xff] %v303_v48 }
  0x3f   : > { %328 = vst [vmem:[%s603_s23 + $0x8] sm:$0xff] %v304_v49  ;;  %329 = vst [vmem:[%s603_s23 + $0x10] sm:$0xff] %v305_v50 }
  0x40   : > { %330 = vst [vmem:[%s603_s23 + $0x18] sm:$0xff] %v306_v51 }
  0x41 PF: > { %s12_s11 = sadd.s32 1, %s555_s11   ;;  %s637_s9 = smov %s551_s10 }
  0x42   : > { %p9_p5 = scmp.ge.s32.totalorder %s12_s11, 4   ;;  %s638_s10 = smov %s640_s12 }
  0x44   :  { %11 = sbr.rel (!%p9_p5) target bundleno = 2 (0x2), region = 67 }

</bundles_post_ra>
